<compile_context>
chip_gen: v7x
topology: tpu7x:2x2x1
jax: 0.10.0
libtpu: 0.0.40
codegen_flags: <defaults>
</compile_context>

<pallas_src>
import jax
import jax.numpy as jnp
import numpy as np
from jax.experimental import pallas as pl
from jax.experimental.pallas import tpu as pltpu  # imported for parity; not needed at these shapes

ALPHA = 0.1
EPS = 1e-8


def _row_losses(p, t):
    """p, t: (R, N) f32. Returns (R, 1) per-row loss = MSE + ALPHA*(1 - PLCC).

    Two-pass centered statistics (matches torch.cov / torch.std, unbiased):
      pass 1: row sums of p and t                      -> means
      pass 2: row sums of dp*dp, dt*dt, dp*dt, (p-t)^2 -> var / cov / mse
    Each pass is a single fused lane-axis reduction over a stacked tensor
    (stacking on a new *leading* axis is pure vreg bookkeeping on TPU).
    """
    r, n = p.shape
    inv_n = 1.0 / n
    # torch.std / torch.cov of a single element are NaN (unbiased); propagate
    # that so the caller's isnan() branch behaves like PyTorch.
    inv_nm1 = 1.0 / (n - 1) if n > 1 else float("nan")

    # Pass 1: one reduction for both row-sum sets.
    sums = jnp.sum(jnp.stack([p, t], axis=0), axis=-1, keepdims=True)   # (2, R, 1)
    mean_p = sums[0] * inv_n                                            # (R, 1)
    mean_t = sums[1] * inv_n                                            # (R, 1)

    # Pass 2: one reduction for all centered / difference products.
    dp = p - mean_p
    dt = t - mean_t
    d = p - t
    prods = jnp.stack([dp * dp, dt * dt, dp * dt, d * d], axis=0)       # (4, R, N)
    ss = jnp.sum(prods, axis=-1, keepdims=True)                         # (4, R, 1)

    var_p = jnp.maximum(ss[0], 0.0) * inv_nm1
    var_t = jnp.maximum(ss[1], 0.0) * inv_nm1
    cov = ss[2] * inv_nm1
    mse = ss[3] * inv_n

    denom = jnp.sqrt(var_p * var_t) + EPS
    # EUP approximate reciprocal (its own VLIW slot) + one Newton-Raphson step
    # to recover ~f32 accuracy without a serialized f32 divide.
    r0 = pl.reciprocal(denom, approx=True)
    recip = r0 * (2.0 - denom * r0)
    plcc = jnp.clip(cov * recip, -1.0 + EPS, 1.0 - EPS)
    # torch.clamp propagates NaN; don't rely on clip's NaN behavior on TPU.
    plcc = jnp.where(jnp.isnan(cov), jnp.nan, plcc)

    return mse + ALPHA * (1.0 - plcc)


def fused_loss_kernel(cont_pred_ref, cont_tgt_ref, ov_pred_ref, ov_tgt_ref, out_ref):
    """Single-launch fused loss.

    cont_pred_ref / cont_tgt_ref : (B, S)  continuous predictions / labels
    ov_pred_ref   / ov_tgt_ref   : (1, B)  overall predictions / labels
    out_ref                      : (1, 1)  final scalar loss
    """
    cp = cont_pred_ref[...].astype(jnp.float32)
    ct = cont_tgt_ref[...].astype(jnp.float32)
    op = ov_pred_ref[...].astype(jnp.float32)
    ot = ov_tgt_ref[...].astype(jnp.float32)

    b = cp.shape[0]

    # Continuous part: per-pair loss, then mean over the B pairs.
    per_pair = _row_losses(cp, ct)                                      # (B, 1)
    cont_loss = jnp.sum(per_pair, axis=0, keepdims=True) * (1.0 / b)    # (1, 1)

    # Overall part: a single length-B row.
    overall_loss = _row_losses(op, ot)                                  # (1, 1)

    # If overall is NaN -> continuous only, else average of the two.
    out_ref[...] = jnp.where(jnp.isnan(overall_loss),
                             cont_loss,
                             0.5 * (cont_loss + overall_loss))


@jax.jit
def loss_forward(y_hat_overall, y_hat_cont, y_overall, y_cont):
    """Mirrors Loss.forward.

    y_hat_overall: (B, 1)     overall predictions (torch: stack(a[0]), squeeze(-1))
    y_hat_cont:    (B, S, 1)  continuous predictions (torch: a[1].squeeze(-1) per item)
    y_overall:     (B,)       overall labels (cast to float)
    y_cont:        (B, S)     continuous labels
    """
    B, S = y_cont.shape

    # Contiguous reshapes only: under the default row-major layout these are
    # metadata-only bitcasts, so no slice/transpose/broadcast op is
    # materialized around the custom call (unlike the previous [..., 0] /
    # [None, :] relayouts).
    cont_pred = y_hat_cont.reshape(B, S)
    cont_tgt = y_cont
    ov_pred = y_hat_overall.reshape(1, B)
    ov_tgt = y_overall.reshape(1, B)

    cost = pl.CostEstimate(
        flops=14 * (B * S + B),
        transcendentals=2 * (B + 1),
        bytes_accessed=(cont_pred.size + cont_tgt.size) * cont_pred.dtype.itemsize
        + (ov_pred.size + ov_tgt.size) * ov_pred.dtype.itemsize
        + 4,
    )

    out = pl.pallas_call(
        fused_loss_kernel,
        out_shape=jax.ShapeDtypeStruct((1, 1), jnp.float32),
        in_specs=[
            pl.BlockSpec((B, S), lambda: (0, 0)),
            pl.BlockSpec((B, S), lambda: (0, 0)),
            pl.BlockSpec((1, B), lambda: (0, 0)),
            pl.BlockSpec((1, B), lambda: (0, 0)),
        ],
        out_specs=pl.BlockSpec((1, 1), lambda: (0, 0)),
        cost_estimate=cost,
    )(cont_pred, cont_tgt, ov_pred, ov_tgt)
    return out.reshape(())


def _reference_loss(y_hat_overall, y_hat_cont, y_overall, y_cont):
    """Pure-NumPy float64 reference mirroring the PyTorch semantics."""
    def pair_loss(p, t):
        p = p.astype(np.float64)
        t = t.astype(np.float64)
        n = p.shape[0]
        mse = np.mean((p - t) ** 2)
        pc = p - p.mean()
        tc = t - t.mean()
        cov = np.sum(pc * tc) / (n - 1)
        std_p = np.sqrt(np.sum(pc * pc) / (n - 1))
        std_t = np.sqrt(np.sum(tc * tc) / (n - 1))
        plcc = cov / (std_p * std_t + EPS)
        plcc = np.clip(plcc, -1.0 + EPS, 1.0 - EPS)
        return mse + ALPHA * (1.0 - plcc)

    B = y_overall.shape[0]
    cont = np.mean([pair_loss(y_hat_cont[b, :, 0], y_cont[b]) for b in range(B)])
    overall = pair_loss(y_hat_overall[:, 0], y_overall.astype(np.float64))
    if np.isnan(overall):
        return cont
    return (cont + overall) / 2.0


if __name__ == "__main__":
    B, S = 4, 8  # batch of (overall, continuous) pairs; continuous sequence length
    key = jax.random.PRNGKey(0)
    k1, k2, k3, k4 = jax.random.split(key, 4)

    # Quality-score-like data (high mean, modest spread) — exercises the
    # centered PLCC path that the raw-moment version would have gotten wrong.
    y_hat_overall = 3.5 + 0.7 * jax.random.normal(k1, (B, 1), dtype=jnp.float32)
    y_hat_cont = 3.5 + 0.7 * jax.random.normal(k2, (B, S, 1), dtype=jnp.float32)
    y_overall = 3.5 + 0.7 * jax.random.normal(k3, (B,), dtype=jnp.float32)
    y_cont = 3.5 + 0.7 * jax.random.normal(k4, (B, S), dtype=jnp.float32)

    loss = loss_forward(y_hat_overall, y_hat_cont, y_overall, y_cont)
    loss = jax.block_until_ready(loss)

    ref = _reference_loss(np.asarray(y_hat_overall), np.asarray(y_hat_cont),
                          np.asarray(y_overall), np.asarray(y_cont))
    assert np.allclose(float(loss), ref, rtol=1e-4, atol=1e-5), (float(loss), ref)

    print("KERNEL_OK")
</pallas_src>

<mosaic_0001>
module attributes {stable_mosaic.version = 11 : i64} {
  func.func @fused_loss_kernel(%arg0: memref<4x8xf32, #tpu.memory_space<vmem>>, %arg1: memref<4x8xf32, #tpu.memory_space<vmem>>, %arg2: memref<1x4xf32, #tpu.memory_space<vmem>>, %arg3: memref<1x4xf32, #tpu.memory_space<vmem>>, %arg4: memref<1x1xf32, #tpu.memory_space<vmem>>) attributes {dimension_semantics = [], scalar_prefetch = 0 : i64, scratch_operands = 0 : i64, tpu.core_type = #tpu.core_type<tc>} {
    %c0 = arith.constant 0 : index
    %c0_0 = arith.constant 0 : index
    %0 = vector.load %arg0[%c0, %c0_0] : memref<4x8xf32, #tpu.memory_space<vmem>>, vector<4x8xf32>
    %c0_1 = arith.constant 0 : index
    %c0_2 = arith.constant 0 : index
    %1 = vector.load %arg1[%c0_1, %c0_2] : memref<4x8xf32, #tpu.memory_space<vmem>>, vector<4x8xf32>
    %c0_3 = arith.constant 0 : index
    %c0_4 = arith.constant 0 : index
    %2 = vector.load %arg2[%c0_3, %c0_4] : memref<1x4xf32, #tpu.memory_space<vmem>>, vector<1x4xf32>
    %c0_5 = arith.constant 0 : index
    %c0_6 = arith.constant 0 : index
    %3 = vector.load %arg3[%c0_5, %c0_6] : memref<1x4xf32, #tpu.memory_space<vmem>>, vector<1x4xf32>
    %4 = vector.shape_cast %0 : vector<4x8xf32> to vector<1x4x8xf32>
    %5 = vector.shape_cast %1 : vector<4x8xf32> to vector<1x4x8xf32>
    %6 = tpu.concatenate %4, %5 in 0 : vector<1x4x8xf32>, vector<1x4x8xf32> -> vector<2x4x8xf32>
    %cst = arith.constant dense<0.000000e+00> : vector<2x4xf32>
    %7 = vector.multi_reduction <add>, %6, %cst [2] : vector<2x4x8xf32> to vector<2x4xf32>
    %8 = vector.shape_cast %7 : vector<2x4xf32> to vector<2x4x1xf32>
    %9 = vector.extract_strided_slice %8 {offsets = [0, 0, 0], sizes = [1, 4, 1], strides = [1, 1, 1]} : vector<2x4x1xf32> to vector<1x4x1xf32>
    %10 = vector.shape_cast %9 : vector<1x4x1xf32> to vector<4x1xf32>
    %cst_7 = arith.constant 1.250000e-01 : f32
    %11 = vector.broadcast %cst_7 : f32 to vector<4x1xf32>
    %12 = arith.mulf %10, %11 : vector<4x1xf32>
    %13 = vector.extract_strided_slice %8 {offsets = [1, 0, 0], sizes = [1, 4, 1], strides = [1, 1, 1]} : vector<2x4x1xf32> to vector<1x4x1xf32>
    %14 = vector.shape_cast %13 : vector<1x4x1xf32> to vector<4x1xf32>
    %cst_8 = arith.constant 1.250000e-01 : f32
    %15 = vector.broadcast %cst_8 : f32 to vector<4x1xf32>
    %16 = arith.mulf %14, %15 : vector<4x1xf32>
    %17 = vector.broadcast %12 : vector<4x1xf32> to vector<4x8xf32>
    %18 = arith.subf %0, %17 : vector<4x8xf32>
    %19 = vector.broadcast %16 : vector<4x1xf32> to vector<4x8xf32>
    %20 = arith.subf %1, %19 : vector<4x8xf32>
    %21 = arith.subf %0, %1 : vector<4x8xf32>
    %22 = arith.mulf %18, %18 : vector<4x8xf32>
    %23 = arith.mulf %20, %20 : vector<4x8xf32>
    %24 = arith.mulf %18, %20 : vector<4x8xf32>
    %25 = arith.mulf %21, %21 : vector<4x8xf32>
    %26 = vector.shape_cast %22 : vector<4x8xf32> to vector<1x4x8xf32>
    %27 = vector.shape_cast %23 : vector<4x8xf32> to vector<1x4x8xf32>
    %28 = vector.shape_cast %24 : vector<4x8xf32> to vector<1x4x8xf32>
    %29 = vector.shape_cast %25 : vector<4x8xf32> to vector<1x4x8xf32>
    %30 = tpu.concatenate %26, %27, %28, %29 in 0 : vector<1x4x8xf32>, vector<1x4x8xf32>, vector<1x4x8xf32>, vector<1x4x8xf32> -> vector<4x4x8xf32>
    %cst_9 = arith.constant dense<0.000000e+00> : vector<4x4xf32>
    %31 = vector.multi_reduction <add>, %30, %cst_9 [2] : vector<4x4x8xf32> to vector<4x4xf32>
    %32 = vector.shape_cast %31 : vector<4x4xf32> to vector<4x4x1xf32>
    %33 = vector.extract_strided_slice %32 {offsets = [0, 0, 0], sizes = [1, 4, 1], strides = [1, 1, 1]} : vector<4x4x1xf32> to vector<1x4x1xf32>
    %34 = vector.shape_cast %33 : vector<1x4x1xf32> to vector<4x1xf32>
    %cst_10 = arith.constant 0.000000e+00 : f32
    %35 = vector.broadcast %cst_10 : f32 to vector<4x1xf32>
    %36 = arith.maximumf %34, %35 : vector<4x1xf32>
    %cst_11 = arith.constant 0.142857149 : f32
    %37 = vector.broadcast %cst_11 : f32 to vector<4x1xf32>
    %38 = arith.mulf %36, %37 : vector<4x1xf32>
    %39 = vector.extract_strided_slice %32 {offsets = [1, 0, 0], sizes = [1, 4, 1], strides = [1, 1, 1]} : vector<4x4x1xf32> to vector<1x4x1xf32>
    %40 = vector.shape_cast %39 : vector<1x4x1xf32> to vector<4x1xf32>
    %cst_12 = arith.constant 0.000000e+00 : f32
    %41 = vector.broadcast %cst_12 : f32 to vector<4x1xf32>
    %42 = arith.maximumf %40, %41 : vector<4x1xf32>
    %cst_13 = arith.constant 0.142857149 : f32
    %43 = vector.broadcast %cst_13 : f32 to vector<4x1xf32>
    %44 = arith.mulf %42, %43 : vector<4x1xf32>
    %45 = vector.extract_strided_slice %32 {offsets = [2, 0, 0], sizes = [1, 4, 1], strides = [1, 1, 1]} : vector<4x4x1xf32> to vector<1x4x1xf32>
    %46 = vector.shape_cast %45 : vector<1x4x1xf32> to vector<4x1xf32>
    %cst_14 = arith.constant 0.142857149 : f32
    %47 = vector.broadcast %cst_14 : f32 to vector<4x1xf32>
    %48 = arith.mulf %46, %47 : vector<4x1xf32>
    %49 = vector.extract_strided_slice %32 {offsets = [3, 0, 0], sizes = [1, 4, 1], strides = [1, 1, 1]} : vector<4x4x1xf32> to vector<1x4x1xf32>
    %50 = vector.shape_cast %49 : vector<1x4x1xf32> to vector<4x1xf32>
    %cst_15 = arith.constant 1.250000e-01 : f32
    %51 = vector.broadcast %cst_15 : f32 to vector<4x1xf32>
    %52 = arith.mulf %50, %51 : vector<4x1xf32>
    %53 = arith.mulf %38, %44 : vector<4x1xf32>
    %54 = math.sqrt %53 : vector<4x1xf32>
    %cst_16 = arith.constant 9.99999993E-9 : f32
    %55 = vector.broadcast %cst_16 : f32 to vector<4x1xf32>
    %56 = arith.addf %54, %55 : vector<4x1xf32>
    %57 = tpu.reciprocal %56 {approx = true} : vector<4x1xf32> -> vector<4x1xf32>
    %58 = arith.mulf %56, %57 : vector<4x1xf32>
    %cst_17 = arith.constant 2.000000e+00 : f32
    %59 = vector.broadcast %cst_17 : f32 to vector<4x1xf32>
    %60 = arith.subf %59, %58 : vector<4x1xf32>
    %61 = arith.mulf %57, %60 : vector<4x1xf32>
    %62 = arith.mulf %48, %61 : vector<4x1xf32>
    %cst_18 = arith.constant -1.000000e+00 : f32
    %cst_19 = arith.constant 1.000000e+00 : f32
    %63 = vector.broadcast %cst_18 : f32 to vector<4x1xf32>
    %64 = arith.maximumf %63, %62 : vector<4x1xf32>
    %65 = vector.broadcast %cst_19 : f32 to vector<4x1xf32>
    %66 = arith.minimumf %65, %64 : vector<4x1xf32>
    %67 = arith.cmpf one, %48, %48 : vector<4x1xf32>
    %cst_20 = arith.constant 0x7FC00000 : f32
    %68 = vector.broadcast %cst_20 : f32 to vector<4x1xf32>
    %69 = arith.select %67, %68, %66 : vector<4x1xi1>, vector<4x1xf32>
    %cst_21 = arith.constant 1.000000e+00 : f32
    %70 = vector.broadcast %cst_21 : f32 to vector<4x1xf32>
    %71 = arith.subf %70, %69 : vector<4x1xf32>
    %cst_22 = arith.constant 1.000000e-01 : f32
    %72 = vector.broadcast %cst_22 : f32 to vector<4x1xf32>
    %73 = arith.mulf %72, %71 : vector<4x1xf32>
    %74 = arith.addf %52, %73 : vector<4x1xf32>
    %cst_23 = arith.constant dense<0.000000e+00> : vector<1xf32>
    %75 = vector.multi_reduction <add>, %74, %cst_23 [0] : vector<4x1xf32> to vector<1xf32>
    %76 = vector.shape_cast %75 : vector<1xf32> to vector<1x1xf32>
    %cst_24 = arith.constant 2.500000e-01 : f32
    %77 = vector.broadcast %cst_24 : f32 to vector<1x1xf32>
    %78 = arith.mulf %76, %77 : vector<1x1xf32>
    %79 = vector.shape_cast %2 : vector<1x4xf32> to vector<1x1x4xf32>
    %80 = vector.shape_cast %3 : vector<1x4xf32> to vector<1x1x4xf32>
    %81 = tpu.concatenate %79, %80 in 0 : vector<1x1x4xf32>, vector<1x1x4xf32> -> vector<2x1x4xf32>
    %cst_25 = arith.constant dense<0.000000e+00> : vector<2x1xf32>
    %82 = vector.multi_reduction <add>, %81, %cst_25 [2] : vector<2x1x4xf32> to vector<2x1xf32>
    %83 = vector.shape_cast %82 : vector<2x1xf32> to vector<2x1x1xf32>
    %84 = vector.extract_strided_slice %83 {offsets = [0, 0, 0], sizes = [1, 1, 1], strides = [1, 1, 1]} : vector<2x1x1xf32> to vector<1x1x1xf32>
    %85 = vector.shape_cast %84 : vector<1x1x1xf32> to vector<1x1xf32>
    %cst_26 = arith.constant 2.500000e-01 : f32
    %86 = vector.broadcast %cst_26 : f32 to vector<1x1xf32>
    %87 = arith.mulf %85, %86 : vector<1x1xf32>
    %88 = vector.extract_strided_slice %83 {offsets = [1, 0, 0], sizes = [1, 1, 1], strides = [1, 1, 1]} : vector<2x1x1xf32> to vector<1x1x1xf32>
    %89 = vector.shape_cast %88 : vector<1x1x1xf32> to vector<1x1xf32>
    %cst_27 = arith.constant 2.500000e-01 : f32
    %90 = vector.broadcast %cst_27 : f32 to vector<1x1xf32>
    %91 = arith.mulf %89, %90 : vector<1x1xf32>
    %92 = vector.broadcast %87 : vector<1x1xf32> to vector<1x4xf32>
    %93 = arith.subf %2, %92 : vector<1x4xf32>
    %94 = vector.broadcast %91 : vector<1x1xf32> to vector<1x4xf32>
    %95 = arith.subf %3, %94 : vector<1x4xf32>
    %96 = arith.subf %2, %3 : vector<1x4xf32>
    %97 = arith.mulf %93, %93 : vector<1x4xf32>
    %98 = arith.mulf %95, %95 : vector<1x4xf32>
    %99 = arith.mulf %93, %95 : vector<1x4xf32>
    %100 = arith.mulf %96, %96 : vector<1x4xf32>
    %101 = vector.shape_cast %97 : vector<1x4xf32> to vector<1x1x4xf32>
    %102 = vector.shape_cast %98 : vector<1x4xf32> to vector<1x1x4xf32>
    %103 = vector.shape_cast %99 : vector<1x4xf32> to vector<1x1x4xf32>
    %104 = vector.shape_cast %100 : vector<1x4xf32> to vector<1x1x4xf32>
    %105 = tpu.concatenate %101, %102, %103, %104 in 0 : vector<1x1x4xf32>, vector<1x1x4xf32>, vector<1x1x4xf32>, vector<1x1x4xf32> -> vector<4x1x4xf32>
    %cst_28 = arith.constant dense<0.000000e+00> : vector<4x1xf32>
    %106 = vector.multi_reduction <add>, %105, %cst_28 [2] : vector<4x1x4xf32> to vector<4x1xf32>
    %107 = vector.shape_cast %106 : vector<4x1xf32> to vector<4x1x1xf32>
    %108 = vector.extract_strided_slice %107 {offsets = [0, 0, 0], sizes = [1, 1, 1], strides = [1, 1, 1]} : vector<4x1x1xf32> to vector<1x1x1xf32>
    %109 = vector.shape_cast %108 : vector<1x1x1xf32> to vector<1x1xf32>
    %cst_29 = arith.constant 0.000000e+00 : f32
    %110 = vector.broadcast %cst_29 : f32 to vector<1x1xf32>
    %111 = arith.maximumf %109, %110 : vector<1x1xf32>
    %cst_30 = arith.constant 0.333333343 : f32
    %112 = vector.broadcast %cst_30 : f32 to vector<1x1xf32>
    %113 = arith.mulf %111, %112 : vector<1x1xf32>
    %114 = vector.extract_strided_slice %107 {offsets = [1, 0, 0], sizes = [1, 1, 1], strides = [1, 1, 1]} : vector<4x1x1xf32> to vector<1x1x1xf32>
    %115 = vector.shape_cast %114 : vector<1x1x1xf32> to vector<1x1xf32>
    %cst_31 = arith.constant 0.000000e+00 : f32
    %116 = vector.broadcast %cst_31 : f32 to vector<1x1xf32>
    %117 = arith.maximumf %115, %116 : vector<1x1xf32>
    %cst_32 = arith.constant 0.333333343 : f32
    %118 = vector.broadcast %cst_32 : f32 to vector<1x1xf32>
    %119 = arith.mulf %117, %118 : vector<1x1xf32>
    %120 = vector.extract_strided_slice %107 {offsets = [2, 0, 0], sizes = [1, 1, 1], strides = [1, 1, 1]} : vector<4x1x1xf32> to vector<1x1x1xf32>
    %121 = vector.shape_cast %120 : vector<1x1x1xf32> to vector<1x1xf32>
    %cst_33 = arith.constant 0.333333343 : f32
    %122 = vector.broadcast %cst_33 : f32 to vector<1x1xf32>
    %123 = arith.mulf %121, %122 : vector<1x1xf32>
    %124 = vector.extract_strided_slice %107 {offsets = [3, 0, 0], sizes = [1, 1, 1], strides = [1, 1, 1]} : vector<4x1x1xf32> to vector<1x1x1xf32>
    %125 = vector.shape_cast %124 : vector<1x1x1xf32> to vector<1x1xf32>
    %cst_34 = arith.constant 2.500000e-01 : f32
    %126 = vector.broadcast %cst_34 : f32 to vector<1x1xf32>
    %127 = arith.mulf %125, %126 : vector<1x1xf32>
    %128 = arith.mulf %113, %119 : vector<1x1xf32>
    %129 = math.sqrt %128 : vector<1x1xf32>
    %cst_35 = arith.constant 9.99999993E-9 : f32
    %130 = vector.broadcast %cst_35 : f32 to vector<1x1xf32>
    %131 = arith.addf %129, %130 : vector<1x1xf32>
    %132 = tpu.reciprocal %131 {approx = true} : vector<1x1xf32> -> vector<1x1xf32>
    %133 = arith.mulf %131, %132 : vector<1x1xf32>
    %cst_36 = arith.constant 2.000000e+00 : f32
    %134 = vector.broadcast %cst_36 : f32 to vector<1x1xf32>
    %135 = arith.subf %134, %133 : vector<1x1xf32>
    %136 = arith.mulf %132, %135 : vector<1x1xf32>
    %137 = arith.mulf %123, %136 : vector<1x1xf32>
    %cst_37 = arith.constant -1.000000e+00 : f32
    %cst_38 = arith.constant 1.000000e+00 : f32
    %138 = vector.broadcast %cst_37 : f32 to vector<1x1xf32>
    %139 = arith.maximumf %138, %137 : vector<1x1xf32>
    %140 = vector.broadcast %cst_38 : f32 to vector<1x1xf32>
    %141 = arith.minimumf %140, %139 : vector<1x1xf32>
    %142 = arith.cmpf one, %123, %123 : vector<1x1xf32>
    %cst_39 = arith.constant 0x7FC00000 : f32
    %143 = vector.broadcast %cst_39 : f32 to vector<1x1xf32>
    %144 = arith.select %142, %143, %141 : vector<1x1xi1>, vector<1x1xf32>
    %cst_40 = arith.constant 1.000000e+00 : f32
    %145 = vector.broadcast %cst_40 : f32 to vector<1x1xf32>
    %146 = arith.subf %145, %144 : vector<1x1xf32>
    %cst_41 = arith.constant 1.000000e-01 : f32
    %147 = vector.broadcast %cst_41 : f32 to vector<1x1xf32>
    %148 = arith.mulf %147, %146 : vector<1x1xf32>
    %149 = arith.addf %127, %148 : vector<1x1xf32>
    %150 = arith.cmpf one, %149, %149 : vector<1x1xf32>
    %151 = arith.addf %78, %149 : vector<1x1xf32>
    %cst_42 = arith.constant 5.000000e-01 : f32
    %152 = vector.broadcast %cst_42 : f32 to vector<1x1xf32>
    %153 = arith.mulf %152, %151 : vector<1x1xf32>
    %154 = arith.select %150, %78, %153 : vector<1x1xi1>, vector<1x1xf32>
    %c0_43 = arith.constant 0 : index
    %c0_44 = arith.constant 0 : index
    %155 = vector.load %arg4[%c0_43, %c0_44] : memref<1x1xf32, #tpu.memory_space<vmem>>, vector<1x1xf32>
    tpu.vector_store %arg4[%c0_43, %c0_44], %154 {strides = array<i32>} : memref<1x1xf32, #tpu.memory_space<vmem>>, vector<1x1xf32>,
    return
  }
}

</mosaic_0001>

<bundles_post_ra>
// kernel: loss_forward.1
= control target key start
LH: loop header
LB: loop body
LE: loop exit
PB: predicated region body
PF: predicated region fallthrough
CT: control target
= control target key end

     0   :  { %vm22_vm0 = vcmask 60416   ;;  %vm86_vm1 = vcmask 24576   ;;  %s258_s0 = inlined_call_operand.vmem [shape: f32[4,8], index: 0, kind: input, shape index: {}]   ;;  %s259_s1 = inlined_call_operand.vmem [shape: f32[4,8], index: 1, kind: input, shape index: {}]   ;;  %s260_s2 = inlined_call_operand.vmem [shape: f32[1,4], index: 2, kind: input, shape index: {}]   ;;  %s261_s3 = inlined_call_operand.vmem [shape: f32[1,4], index: 3, kind: input, shape index: {}]   ;;  %s262_s4 = inlined_call_operand.hbm [shape: f32[1,1], index: 4, kind: output, shape index: {}]  }
   0x1   :  { %v18_v0 = vld [vmem:[%s258_s0] sm:$0xf] }
   0x2   :  { %v20_v1 = vld [vmem:[%s260_s2] sm:$0x1]  ;;  %v23_v2 = vsel %vm22_vm0, %v18_v0, 0.0 }
   0x3   :  { %v87_v3 = vsel %vm86_vm1, %v20_v1, 0.0  ;;  %v19_v4 = vld [vmem:[%s259_s1] sm:$0xf]  ;;  %24 = vadd.xlane.f32.xlu0 %v23_v2 }
   0x4   :  { %v21_v5 = vld [vmem:[%s261_s3] sm:$0x1]  ;;  %88 = vadd.xlane.f32.xlu1 %v87_v3 }
   0x5   :  { %9 = vsyncpa [#allocation3], 0  ;;  %v26_v6 = vsel %vm22_vm0, %v19_v4, 0.0  ;;  %v90_v7 = vsel %vm86_vm1, %v21_v5, 0.0  ;;  %v33_v26 = vsub.f32 %v18_v0, %v19_v4  ;;  %v97_v32 = vsub.f32 %v20_v1, %v21_v5  ;;  %s196_s0 = smov [#allocation2]  }
   0x6   :  { %vm77_vm7 = vcmask 1043456   ;;  %s153_s1 = sshll.u32 %s196_s0, 4  ;;  %vm145_vm9 = vcmask 0   ;;  %s154_s1 = int_to_ptr.vmem [resolvable:$true] %s153_s1 }
   0x7   :  { %27 = vadd.xlane.f32.xlu0 %v26_v6  ;;  %v37_v31 = vmul.f32 %v33_v26, %v33_v26  ;;  %v101_v36 = vmul.f32 %v97_v32, %v97_v32  ;;  %s172_s2 = scalar_lea.vmem %s154_s1, 16  ;;  %s176_s3 = scalar_lea.vmem %s154_s1, 32 }
   0x8   :  { %91 = vadd.xlane.f32.xlu1 %v90_v7  ;;  %p173_p0 = scmp.ne.s32.totalorder %s154_s1, %s172_s2  ;;  %p177_p1 = scmp.lt.s32.totalorder %s154_s1, %s154_s1 }
   0x9   :  { %v47_v35 = vsel %vm22_vm0, %v37_v31, 0.0  ;;  %v111_v37 = vsel %vm86_vm1, %v101_v36, 0.0  ;;  %p178_p2 = scmp.lt.s32.totalorder %s176_s3, %s172_s2 }
   0xb   :  { %p179_p3 = por %p178_p2, %p177_p1 }
   0xd   :  { %p180_p4 = pnand %p179_p3, %p173_p0 }
  0x90   :  { %v25_v8 = vpop.xlane.xlu0 %24 }
  0x91   :  { %v89_v9 = vpop.xlane.xlu1 %88  ;;  %v29_v10 = vmul.f32 0.125, %v25_v8 }
  0x92   :  { %v93_v11 = vmul.f32 0.25, %v89_v9 }
  0x93   :  { %v31_v12 = vsub.f32 %v18_v0, %v29_v10 }
  0x94   :  { %v95_v13 = vsub.f32 %v20_v1, %v93_v11  ;;  %v28_v14 = vpop.xlane.xlu0 %27 }
  0x95   :  { %v92_v15 = vpop.xlane.xlu1 %91  ;;  %v30_v16 = vmul.f32 0.125, %v28_v14  ;;  %v34_v18 = vmul.f32 %v31_v12, %v31_v12 }
  0x96   :  { %v94_v17 = vmul.f32 0.25, %v92_v15  ;;  %v98_v19 = vmul.f32 %v95_v13, %v95_v13 }
  0x97   :  { %v32_v20 = vsub.f32 %v19_v4, %v30_v16  ;;  %v38_v22 = vsel %vm22_vm0, %v34_v18, 0.0 }
  0x98   :  { %v96_v21 = vsub.f32 %v21_v5, %v94_v17  ;;  %39 = vadd.xlane.f32.xlu0 %v38_v22  ;;  %v102_v23 = vsel %vm86_vm1, %v98_v19, 0.0 }
  0x99   :  { %v35_v24 = vmul.f32 %v32_v20, %v32_v20  ;;  %v36_v28 = vmul.f32 %v32_v20, %v31_v12 }
  0x9a   :  { %v99_v25 = vmul.f32 %v96_v21, %v96_v21  ;;  %v100_v30 = vmul.f32 %v96_v21, %v95_v13 }
  0x9b   :  { %v41_v27 = vsel %vm22_vm0, %v35_v24, 0.0  ;;  %v44_v33 = vsel %vm22_vm0, %v36_v28, 0.0 }
  0x9c   :  { %103 = vadd.xlane.f32.xlu0 %v102_v23  ;;  %42 = vadd.xlane.f32.xlu1 %v41_v27  ;;  %v105_v29 = vsel %vm86_vm1, %v99_v25, 0.0  ;;  %v108_v34 = vsel %vm86_vm1, %v100_v30, 0.0 }
  0xa0   :  { %45 = vadd.xlane.f32.xlu0 %v44_v33  ;;  %106 = vadd.xlane.f32.xlu1 %v105_v29 }
  0xa4   :  { %109 = vadd.xlane.f32.xlu0 %v108_v34  ;;  %48 = vadd.xlane.f32.xlu1 %v47_v35 }
  0xa8   :  { %112 = vadd.xlane.f32.xlu1 %v111_v37 }
 0x125   :  { %v40_v38 = vpop.xlane.xlu0 %39 }
 0x126   :  { %v50_v39 = vmax.f32 %v40_v38, 0.0 }
 0x128   :  { %v51_v44 = vmul.f32 0.14285715, %v50_v39 }
 0x129   :  { %v43_v40 = vpop.xlane.xlu1 %42  ;;  %v104_v41 = vpop.xlane.xlu0 %103 }
 0x12a   :  { %v52_v42 = vmax.f32 %v43_v40, 0.0  ;;  %v114_v43 = vmax.f32 %v104_v41, 0.0 }
 0x12c   :  { %v53_v45 = vmul.f32 0.14285715, %v52_v42  ;;  %v115_v48 = vmul.f32 0.33333334, %v114_v43 }
 0x12d   :  { %v107_v46 = vpop.xlane.xlu1 %106  ;;  %v46_v2 = vpop.xlane.xlu0 %45 }
 0x12e   :  { %v56_v47 = vmul.f32 %v53_v45, %v51_v44  ;;  %v116_v49 = vmax.f32 %v107_v46, 0.0  ;;  %v54_v6 = vmul.f32 0.14285715, %v46_v2 }
 0x130   :  { %164 = vrsqrt.f32 %v56_v47  ;;  %v117_v50 = vmul.f32 0.33333334, %v116_v49  ;;  %vm59_vm2 = vcmp.eq.f32.partialorder %v56_v47, inf  ;;  %v62_v54 = vand.u32 2147483648, %v56_v47 }
 0x131   :  { %vm61_vm3 = vcmp.eq.f32.partialorder %v56_v47, 0.0  ;;  %v110_v10 = vpop.xlane.xlu0 %109  ;;  %v49_v13 = vpop.xlane.xlu1 %48  ;;  %vm72_vm6 = vcmp.ne.f32.partialorder %v54_v6, %v54_v6 }
 0x132   :  { %v120_v51 = vmul.f32 %v117_v50, %v115_v48  ;;  %v118_v14 = vmul.f32 0.33333334, %v110_v10  ;;  %v55_v18 = vmul.f32 0.125, %v49_v13 }
 0x134   :  { %166 = vrsqrt.f32 %v120_v51  ;;  %vm123_vm4 = vcmp.eq.f32.partialorder %v120_v51, inf  ;;  %v126_v60 = vand.u32 2147483648, %v120_v51  ;;  %vm125_vm5 = vcmp.eq.f32.partialorder %v120_v51, 0.0 }
 0x135   :  { %vm136_vm8 = vcmp.ne.f32.partialorder %v118_v14, %v118_v14  ;;  %v113_v28 = vpop.xlane.xlu1 %112 }
 0x136   :  { %v119_v32 = vmul.f32 0.25, %v113_v28 }
 0x13a   :  { %v165_v52 = vpop.eup %164 }
 0x13b   :  { %v58_v53 = vmul.f32 %v165_v52, %v56_v47 }
 0x13d   :  { %v60_v55 = vsel %vm59_vm2, %v56_v47, %v58_v53 }
 0x13e   :  { %v167_v56 = vpop.eup %166  ;;  %v63_v57 = vsel %vm61_vm3, %v62_v54, %v60_v55 }
 0x13f   :  { %v64_v58 = vadd.f32 1e-08, %v63_v57  ;;  %v122_v59 = vmul.f32 %v167_v56, %v120_v51 }
 0x141   :  { %168 = vrcp.f32 %v64_v58  ;;  %v124_v61 = vsel %vm123_vm4, %v120_v51, %v122_v59 }
 0x142   :  { %v127_v62 = vsel %vm125_vm5, %v126_v60, %v124_v61 }
 0x143   :  { %v128_v63 = vadd.f32 1e-08, %v127_v62 }
 0x145   :  { %170 = vrcp.f32 %v128_v63 }
 0x14b   :  { %v169_v0 = vpop.eup %168 }
 0x14c   :  { %v66_v1 = vmul.f32 %v169_v0, %v64_v58 }
 0x14e   :  { %v67_v3 = vsub.f32 2.0, %v66_v1 }
 0x14f   :  { %v171_v4 = vpop.eup %170 }
 0x150   :  { %v68_v5 = vmul.f32 %v169_v0, %v67_v3  ;;  %v130_v7 = vmul.f32 %v171_v4, %v128_v63 }
 0x152   :  { %v69_v8 = vmul.f32 %v68_v5, %v54_v6  ;;  %v131_v9 = vsub.f32 2.0, %v130_v7 }
 0x154   :  { %v161_v11 = vclamps-f32 %v69_v8, 1.0  ;;  %v132_v12 = vmul.f32 %v171_v4, %v131_v9 }
 0x156   :  { %v73_v15 = vsel %vm72_vm6, nan, %v161_v11  ;;  %v133_v17 = vmul.f32 %v132_v12, %v118_v14 }
 0x157   :  { %v74_v16 = vsub.f32 1.0, %v73_v15 }
 0x158   :  { %v162_v20 = vclamps-f32 %v133_v17, 1.0 }
 0x159   :  { %v75_v19 = vmul.f32 0.1, %v74_v16 }
 0x15a   :  { %v137_v24 = vsel %vm136_vm8, nan, %v162_v20 }
 0x15b   :  { %v76_v21 = vadd.f32 %v75_v19, %v55_v18  ;;  %v138_v26 = vsub.f32 1.0, %v137_v24 }
 0x15d   :  { %v78_v22 = vsel %vm77_vm7, %v76_v21, 0.0  ;;  %v139_v30 = vmul.f32 0.1, %v138_v26 }
 0x15e   :  { %v79_v23 = vrot.slane %v78_v22, 4 }
 0x15f   :  { %v140_v35 = vadd.f32 %v139_v30, %v119_v32 }
 0x160   :  { %v80_v25 = vadd.f32 %v79_v23, %v78_v22 }
 0x161   :  { %vm141_vm10 = vcmp.ne.f32.partialorder %v140_v35, %v140_v35 }
 0x162   :  { %v81_v27 = vrot.slane %v80_v25, 2 }
 0x164   :  { %v82_v29 = vadd.f32 %v81_v27, %v80_v25 }
 0x166   :  { %v83_v31 = vrot.slane %v82_v29, 1 }
 0x168   :  { %v84_v33 = vadd.f32 %v83_v31, %v82_v29 }
 0x16a   :  { %v85_v34 = vmul.f32 0.25, %v84_v33 }
 0x16c   :  { %v142_v36 = vadd.f32 %v140_v35, %v85_v34 }
 0x16e   :  { %v143_v37 = vmul.f32 0.5, %v142_v36 }
 0x170   :  { %v144_v38 = vsel %vm141_vm10, %v85_v34, %v143_v37 }
 0x171   :  { %146 = vst.msk [vmem:[#allocation2] sm:$0x1] %vm145_vm9, %v144_v38 }
 0x172   :  { %183 = shalt.err (!%p180_p4)
}
 0x173   :  { %s184_s25 = scalar_lea.hbm %s262_s4, 16 }
 0x174   :  { %p185_p5 = scmp.ne.s32.totalorder %s262_s4, %s184_s25  ;;  %p188_p6 = scmp.lt.u32.totalorder %s184_s25, %s262_s4 }
 0x176   :  { %p190_p7 = pnand %p188_p6, %p185_p5 }
 0x178   :  { %193 = shalt.err (!%p190_p7)
}
 0x179   :  { %156 = dma.vmem_to_hbm [thread:$0]  %s154_s1, 16, %s262_s4, [#allocation3]  }
 0x17a   :  { %194 = dma.done.wait [#allocation3], 16  }
 0x17b   :  { %195 = vsyncadd [#allocation3], 4294967280 }
 0x17c   :  { %160 = vsyncpa [#allocation3], 1 }

</bundles_post_ra>
